<compile_context>
chip_gen: v5e
topology: v5e:2x2
jax: 0.10.0
libtpu: 0.0.40
codegen_flags: <defaults>
</compile_context>

<pallas_src>
import jax
import jax.numpy as jnp
from jax.experimental import pallas as pl
from jax.experimental.pallas import tpu as pltpu


def _maxpool_over_h(x_ref, H, Wf):
    """Max over the H contiguous blocks of width Wf along the flattened last axis.

    x_ref: (Nb, C, H*Wf) VMEM ref.  Returns (Nb, C, Wf).
    """
    h, width = H, H * Wf

    # First reduction reads the two halves straight from VMEM so the full x tile is
    # never materialized in vregs at once.
    if h % 2 == 0:
        half = width // 2
        x = jnp.maximum(x_ref[:, :, :half], x_ref[:, :, half:])
        h, width = h // 2, half
    else:
        x = x_ref[...]

    # Aligned slice halvings while the halves stay 128-lane (vreg) aligned.
    while h % 2 == 0 and (width // 2) % 128 == 0:
        half = width // 2
        x = jnp.maximum(x[..., :half], x[..., half:])
        h, width = h // 2, half

    # Roll+max tree for the remaining power-of-two factor: rolls land in the
    # (otherwise idle) XLU slot, log2(h) steps, full-vreg operands.
    if h > 1 and (h & (h - 1)) == 0 and width % 128 == 0:
        shift = width // 2
        while shift >= Wf:
            x = jnp.maximum(x, pltpu.roll(x, shift, axis=2))
            shift //= 2
        return x[..., :Wf]

    # Fallback for non power-of-two remainders (not hit at the demo shapes).
    xm = x[..., :Wf]
    for i in range(1, h):
        xm = jnp.maximum(xm, x[..., i * Wf:(i + 1) * Wf])
    return xm


def sse_kernel(x_ref, wcp_ref, w1_ref, b1_ref, w2t_ref, b2t_ref, out_ref):
    # x_ref   : (Nb, C, H*Wf)  batch block, flattened spatial axis on lanes
    # wcp_ref : (C, 1)         Conv1d(C->1, k=1) weight (bias folded into b1)
    # w1_ref  : (Wf, Nred)     fc1 weight, stored (in, out)  (== torch weight.T)
    # b1_ref  : (1, Nred)      fc1 bias + folded Conv1d bias
    # w2t_ref : (Nred, H*Wf)   fc2 weight pre-tiled H times along the out axis
    # b2t_ref : (1, H*Wf)      fc2 bias pre-tiled H times
    # out_ref : (Nb, C, H*Wf)
    HW = x_ref.shape[2]
    Wf = w1_ref.shape[0]
    H = HW // Wf

    # --- AdaptiveMaxPool2d((1, N_freq)): max over H via a log2 reduction tree ---
    xm = _maxpool_over_h(x_ref, H, Wf)                       # (Nb, C, Wf)

    # --- Conv1d(C -> 1, k=1) channel pooling: VPU multiply + sublane reduce ---
    xl = jnp.sum(xm * wcp_ref[...][None, :, :], axis=1)      # (Nb, Wf)

    # --- fc path, batched over all Nb samples in the block (M = Nb on the MXU) ---
    h1 = jnp.dot(xl, w1_ref[...], preferred_element_type=jnp.float32) + b1_ref[...]
    h1 = jnp.maximum(h1, 0.0)                                # (Nb, Nred)
    # fc2 against the pre-tiled weight directly yields a lane-dense (Nb, HW) gate —
    # no in-kernel H-way lane concat.
    gate = jax.nn.sigmoid(
        jnp.dot(h1, w2t_ref[...], preferred_element_type=jnp.float32) + b2t_ref[...])

    # --- lane-dense gating multiply + unmasked store (x re-read from VMEM) ---
    out_ref[...] = (x_ref[...] * gate[:, None, :]).astype(out_ref.dtype)


def prepare_params(wcp, bcp, w1, b1, w2, b2, H):
    """One-time, call-invariant parameter preparation (hoisted out of the forward).

    Fold Conv1d bias into fc1 bias:  (xl + bcp) @ W1 + b1 == xl @ W1 + (b1 + bcp*colsum(W1))
    Pre-tile fc2 weight/bias H times so the gate matmul output is lane-dense (H*Wf).
    """
    wcp2 = wcp[:, None]                                   # (C, 1): C on sublanes
    b1_eff = (b1 + bcp * jnp.sum(w1, axis=0))[None, :]    # (1, Nred)
    w2t = jnp.tile(w2, (1, H))                            # (Nred, H*Wf)
    b2t = jnp.tile(b2, (H,))[None, :]                     # (1, H*Wf)
    return wcp2, b1_eff, w2t, b2t


def _choose_batch_block(N, C, HW, itemsize, vmem_budget_bytes=8 * 1024 * 1024):
    """Largest divisor Nb of N whose double-buffered in+out block fits the budget."""
    per_sample = 4 * C * HW * itemsize        # 2 buffers x (input + output) per sample
    limit = max(1, vmem_budget_bytes // per_sample)
    nb = 1
    for d in range(1, N + 1):
        if N % d == 0 and d <= limit:
            nb = d
    return nb


def sse_forward(x, wcp2, w1, b1_eff, w2t, b2t):
    """x: (N, C, H, W) with W == N_freq.  Params from prepare_params(). Returns x * gate."""
    N, C, H, Wf = x.shape
    n_freq, nred = w1.shape
    # TODO(synk): general AdaptiveMaxPool2d((1, N_freq)) binning (W != N_freq) not implemented.
    assert Wf == n_freq, "sSELayer kernel requires the last (spectral) axis to equal N_freq"
    HW = H * Wf
    assert w2t.shape == (nred, HW) and b2t.shape == (1, HW), \
        "fc2 params must be pre-tiled for this H via prepare_params(..., H)"

    x2d = x.reshape(N, C, HW)                 # contiguous reshape: no data movement
    nb = _choose_batch_block(N, C, HW, x2d.dtype.itemsize)

    cost = pl.CostEstimate(
        flops=int(N * C * HW                  # max pool compares
                  + 3 * N * C * Wf            # channel pooling
                  + 2 * N * Wf * nred         # fc1
                  + 2 * N * nred * HW         # fc2 (pre-tiled)
                  + N * C * HW),              # gating multiply
        transcendentals=int(N * HW),          # sigmoid
        bytes_accessed=int((2 * N * C * HW + C + Wf * nred + nred + nred * HW + HW)
                           * x2d.dtype.itemsize),
    )

    out2d = pl.pallas_call(
        sse_kernel,
        out_shape=jax.ShapeDtypeStruct((N, C, HW), x.dtype),
        grid_spec=pltpu.PrefetchScalarGridSpec(
            num_scalar_prefetch=0,
            grid=(N // nb,),
            in_specs=[
                pl.BlockSpec((nb, C, HW), lambda n: (n, 0, 0)),
                pl.BlockSpec((C, 1), lambda n: (0, 0)),
                pl.BlockSpec((n_freq, nred), lambda n: (0, 0)),
                pl.BlockSpec((1, nred), lambda n: (0, 0)),
                pl.BlockSpec((nred, HW), lambda n: (0, 0)),
                pl.BlockSpec((1, HW), lambda n: (0, 0)),
            ],
            out_specs=pl.BlockSpec((nb, C, HW), lambda n: (n, 0, 0)),
        ),
        compiler_params=pltpu.CompilerParams(dimension_semantics=("parallel",)),
        cost_estimate=cost,
    )(x2d, wcp2, w1, b1_eff, w2t, b2t)

    return out2d.reshape(N, C, H, Wf)


def make_params(key, n_freq, channel, reduction=2):
    """Deterministic synthetic parameters. Linear weights stored (in, out) = torch weight.T."""
    nred = n_freq // reduction
    ks = jax.random.split(key, 6)

    def u(k, shape, fan_in):
        bound = 1.0 / (fan_in ** 0.5)
        return jax.random.uniform(k, shape, jnp.float32, -bound, bound)

    wcp = u(ks[0], (channel,), channel)      # Conv1d(channel, 1, k=1) weight (squeezed)
    bcp = u(ks[1], (), channel)              # Conv1d bias
    w1 = u(ks[2], (n_freq, nred), n_freq)    # Linear(N_freq -> N_freq//r), (in, out)
    b1 = u(ks[3], (nred,), n_freq)
    w2 = u(ks[4], (nred, n_freq), nred)      # Linear(N_freq//r -> N_freq), (in, out)
    b2 = u(ks[5], (n_freq,), nred)
    return wcp, bcp, w1, b1, w2, b2


def reference_forward(x, wcp, bcp, w1, b1, w2, b2):
    """Plain-JAX reference matching the PyTorch forward (W == N_freq)."""
    x_avg = jnp.max(x, axis=2)                              # AdaptiveMaxPool2d -> (N, C, N_freq)
    x_lin = jnp.einsum('c,ncf->nf', wcp, x_avg) + bcp       # Conv1d(C->1, k=1) -> (N, N_freq)
    h = jnp.maximum(x_lin @ w1 + b1, 0.0)                   # Linear + ReLU
    g = jax.nn.sigmoid(h @ w2 + b2)                         # Linear + Sigmoid -> (N, N_freq)
    return x * g[:, None, None, :]


if __name__ == "__main__":
    N, C, H, N_FREQ, RED = 2, 4, 16, 16, 2

    key = jax.random.PRNGKey(0)
    kx, kp = jax.random.split(key)
    x = jax.random.normal(kx, (N, C, H, N_FREQ), jnp.float32)
    wcp, bcp, w1, b1, w2, b2 = make_params(kp, N_FREQ, C, RED)

    # One-time parameter preparation (hoisted out of the per-call path).
    wcp2, b1_eff, w2t, b2t = prepare_params(wcp, bcp, w1, b1, w2, b2, H)

    out = sse_forward(x, wcp2, w1, b1_eff, w2t, b2t)
    out = jax.block_until_ready(out)

    ref = jax.block_until_ready(reference_forward(x, wcp, bcp, w1, b1, w2, b2))

    assert out.shape == (N, C, H, N_FREQ), out.shape
    assert jnp.allclose(out, ref, rtol=1e-4, atol=1e-4), float(
        jnp.max(jnp.abs(out - ref)))

    print("KERNEL_OK")
</pallas_src>

<mosaic_0001>
module attributes {stable_mosaic.version = 11 : i64} {
  func.func @sse_kernel(%arg0: i32, %arg1: memref<2x4x256xf32, #tpu.memory_space<vmem>>, %arg2: memref<4x1xf32, #tpu.memory_space<vmem>>, %arg3: memref<16x8xf32, #tpu.memory_space<vmem>>, %arg4: memref<1x8xf32, #tpu.memory_space<vmem>>, %arg5: memref<8x256xf32, #tpu.memory_space<vmem>>, %arg6: memref<1x256xf32, #tpu.memory_space<vmem>>, %arg7: memref<2x4x256xf32, #tpu.memory_space<vmem>>) attributes {dimension_semantics = [#tpu.dimension_semantics<parallel>], iteration_bounds = array<i64: 1>, scalar_prefetch = 0 : i64, scratch_operands = 0 : i64, tpu.core_type = #tpu.core_type<tc>, window_params = [{transform_indices = @transform_0, window_bounds = array<i64: 2, 4, 256>}, {pipeline_mode = #tpu.pipeline_mode<synchronous>, transform_indices = @transform_1, window_bounds = array<i64: 4, 1>}, {pipeline_mode = #tpu.pipeline_mode<synchronous>, transform_indices = @transform_2, window_bounds = array<i64: 16, 8>}, {pipeline_mode = #tpu.pipeline_mode<synchronous>, transform_indices = @transform_3, window_bounds = array<i64: 1, 8>}, {pipeline_mode = #tpu.pipeline_mode<synchronous>, transform_indices = @transform_4, window_bounds = array<i64: 8, 256>}, {pipeline_mode = #tpu.pipeline_mode<synchronous>, transform_indices = @transform_5, window_bounds = array<i64: 1, 256>}, {transform_indices = @transform_6, window_bounds = array<i64: 2, 4, 256>}]} {
    %c0 = arith.constant 0 : index
    %c0_0 = arith.constant 0 : index
    %c0_1 = arith.constant 0 : index
    %0 = vector.load %arg1[%c0, %c0_0, %c0_1] : memref<2x4x256xf32, #tpu.memory_space<vmem>>, vector<2x4x128xf32>
    %c0_2 = arith.constant 0 : index
    %c0_3 = arith.constant 0 : index
    %c128 = arith.constant 128 : index
    %1 = vector.load %arg1[%c0_2, %c0_3, %c128] : memref<2x4x256xf32, #tpu.memory_space<vmem>>, vector<2x4x128xf32>
    %2 = arith.maximumf %0, %1 : vector<2x4x128xf32>
    %c64_i32 = arith.constant 64 : i32
    %3 = tpu.dynamic_rotate %2 by %c64_i32 dim 2 : vector<2x4x128xf32>, i32 -> vector<2x4x128xf32>
    %4 = arith.maximumf %2, %3 : vector<2x4x128xf32>
    %c32_i32 = arith.constant 32 : i32
    %5 = tpu.dynamic_rotate %4 by %c32_i32 dim 2 : vector<2x4x128xf32>, i32 -> vector<2x4x128xf32>
    %6 = arith.maximumf %4, %5 : vector<2x4x128xf32>
    %c16_i32 = arith.constant 16 : i32
    %7 = tpu.dynamic_rotate %6 by %c16_i32 dim 2 : vector<2x4x128xf32>, i32 -> vector<2x4x128xf32>
    %8 = arith.maximumf %6, %7 : vector<2x4x128xf32>
    %9 = vector.extract_strided_slice %8 {offsets = [0, 0, 0], sizes = [2, 4, 16], strides = [1, 1, 1]} : vector<2x4x128xf32> to vector<2x4x16xf32>
    %c0_4 = arith.constant 0 : index
    %c0_5 = arith.constant 0 : index
    %10 = vector.load %arg2[%c0_4, %c0_5] : memref<4x1xf32, #tpu.memory_space<vmem>>, vector<4x1xf32>
    %11 = vector.shape_cast %10 : vector<4x1xf32> to vector<1x4x1xf32>
    %12 = vector.broadcast %11 : vector<1x4x1xf32> to vector<2x4x16xf32>
    %13 = arith.mulf %9, %12 : vector<2x4x16xf32>
    %cst = arith.constant dense<0.000000e+00> : vector<2x16xf32>
    %14 = vector.multi_reduction <add>, %13, %cst [1] : vector<2x4x16xf32> to vector<2x16xf32>
    %c0_6 = arith.constant 0 : index
    %c0_7 = arith.constant 0 : index
    %15 = vector.load %arg3[%c0_6, %c0_7] : memref<16x8xf32, #tpu.memory_space<vmem>>, vector<16x8xf32>
    %cst_8 = arith.constant dense<0.000000e+00> : vector<2x8xf32>
    %16 = tpu.matmul %14, %15, %cst_8 {dimension_numbers = #tpu.dot_dimension_numbers<[1], [0], [0], [1], [0, 0, 1, 1], [], []>} : vector<2x16xf32>, vector<16x8xf32>, vector<2x8xf32> -> vector<2x8xf32>
    %c0_9 = arith.constant 0 : index
    %c0_10 = arith.constant 0 : index
    %17 = vector.load %arg4[%c0_9, %c0_10] : memref<1x8xf32, #tpu.memory_space<vmem>>, vector<1x8xf32>
    %18 = vector.broadcast %17 : vector<1x8xf32> to vector<2x8xf32>
    %19 = arith.addf %16, %18 : vector<2x8xf32>
    %cst_11 = arith.constant 0.000000e+00 : f32
    %20 = vector.broadcast %cst_11 : f32 to vector<2x8xf32>
    %21 = arith.maximumf %19, %20 : vector<2x8xf32>
    %c0_12 = arith.constant 0 : index
    %c0_13 = arith.constant 0 : index
    %22 = vector.load %arg5[%c0_12, %c0_13] : memref<8x256xf32, #tpu.memory_space<vmem>>, vector<8x256xf32>
    %cst_14 = arith.constant dense<0.000000e+00> : vector<2x256xf32>
    %23 = tpu.matmul %21, %22, %cst_14 {dimension_numbers = #tpu.dot_dimension_numbers<[1], [0], [0], [1], [0, 0, 1, 1], [], []>} : vector<2x8xf32>, vector<8x256xf32>, vector<2x256xf32> -> vector<2x256xf32>
    %c0_15 = arith.constant 0 : index
    %c0_16 = arith.constant 0 : index
    %24 = vector.load %arg6[%c0_15, %c0_16] : memref<1x256xf32, #tpu.memory_space<vmem>>, vector<1x256xf32>
    %25 = vector.broadcast %24 : vector<1x256xf32> to vector<2x256xf32>
    %26 = arith.addf %23, %25 : vector<2x256xf32>
    %27 = arith.negf %26 : vector<2x256xf32>
    %28 = math.exp %27 : vector<2x256xf32>
    %cst_17 = arith.constant 1.000000e+00 : f32
    %29 = vector.broadcast %cst_17 : f32 to vector<2x256xf32>
    %30 = arith.addf %29, %28 : vector<2x256xf32>
    %31 = arith.divf %29, %30 : vector<2x256xf32>
    %c0_18 = arith.constant 0 : index
    %c0_19 = arith.constant 0 : index
    %c0_20 = arith.constant 0 : index
    %32 = vector.load %arg1[%c0_18, %c0_19, %c0_20] : memref<2x4x256xf32, #tpu.memory_space<vmem>>, vector<2x4x256xf32>
    %33 = vector.shape_cast %31 : vector<2x256xf32> to vector<2x1x256xf32>
    %34 = vector.broadcast %33 : vector<2x1x256xf32> to vector<2x4x256xf32>
    %35 = arith.mulf %32, %34 : vector<2x4x256xf32>
    %c0_21 = arith.constant 0 : index
    %c0_22 = arith.constant 0 : index
    %c0_23 = arith.constant 0 : index
    %36 = vector.load %arg7[%c0_21, %c0_22, %c0_23] : memref<2x4x256xf32, #tpu.memory_space<vmem>>, vector<2x4x256xf32>
    tpu.vector_store %arg7[%c0_21, %c0_22, %c0_23], %35 {strides = array<i32>} : memref<2x4x256xf32, #tpu.memory_space<vmem>>, vector<2x4x256xf32>,
    return
  }
  func.func @transform_0(%arg0: i32) -> (i32, i32, i32) {
    %c0_i32 = arith.constant 0 : i32
    %c0_i32_0 = arith.constant 0 : i32
    %c0_i32_1 = arith.constant 0 : i32
    return %arg0, %c0_i32, %c0_i32_0 : i32, i32, i32
  }
  func.func @transform_1(%arg0: i32) -> (i32, i32) {
    %c0_i32 = arith.constant 0 : i32
    %c0_i32_0 = arith.constant 0 : i32
    %c0_i32_1 = arith.constant 0 : i32
    return %c0_i32, %c0_i32_0 : i32, i32
  }
  func.func @transform_2(%arg0: i32) -> (i32, i32) {
    %c0_i32 = arith.constant 0 : i32
    %c0_i32_0 = arith.constant 0 : i32
    %c0_i32_1 = arith.constant 0 : i32
    return %c0_i32, %c0_i32_0 : i32, i32
  }
  func.func @transform_3(%arg0: i32) -> (i32, i32) {
    %c0_i32 = arith.constant 0 : i32
    %c0_i32_0 = arith.constant 0 : i32
    %c0_i32_1 = arith.constant 0 : i32
    return %c0_i32, %c0_i32_0 : i32, i32
  }
  func.func @transform_4(%arg0: i32) -> (i32, i32) {
    %c0_i32 = arith.constant 0 : i32
    %c0_i32_0 = arith.constant 0 : i32
    %c0_i32_1 = arith.constant 0 : i32
    return %c0_i32, %c0_i32_0 : i32, i32
  }
  func.func @transform_5(%arg0: i32) -> (i32, i32) {
    %c0_i32 = arith.constant 0 : i32
    %c0_i32_0 = arith.constant 0 : i32
    %c0_i32_1 = arith.constant 0 : i32
    return %c0_i32, %c0_i32_0 : i32, i32
  }
  func.func @transform_6(%arg0: i32) -> (i32, i32, i32) {
    %c0_i32 = arith.constant 0 : i32
    %c0_i32_0 = arith.constant 0 : i32
    %c0_i32_1 = arith.constant 0 : i32
    return %arg0, %c0_i32, %c0_i32_0 : i32, i32, i32
  }
}

</mosaic_0001>

<bundles_post_ra>
// kernel: tpu_custom_call.1
= control target key start
LH: loop header
LB: loop body
LE: loop exit
PB: predicated region body
PF: predicated region fallthrough
CT: control target
= control target key end

     0   :  { %11 = vsyncpa [#allocation3], 0  ;;  %s457_s0 = inlined_call_operand.vmem [shape: f32[2,4,256], index: 0, kind: input, shape index: {}]   ;;  %s458_s1 = inlined_call_operand.vmem [shape: f32[4,1], index: 1, kind: input, shape index: {}]   ;;  %s459_s2 = inlined_call_operand.vmem [shape: f32[16,8], index: 2, kind: input, shape index: {}]   ;;  %s460_s3 = inlined_call_operand.hbm [shape: f32[1,8], index: 3, kind: input, shape index: {}]   ;;  %s461_s4 = inlined_call_operand.vmem [shape: f32[8,256], index: 4, kind: input, shape index: {}]   ;;  %s462_s5 = inlined_call_operand.hbm [shape: f32[1,256], index: 5, kind: input, shape index: {}]   ;;  %s463_s6 = inlined_call_operand.hbm [shape: f32[2,4,256], index: 6, kind: output, shape index: {}]  }
   0x1   :  { %12 = vsyncpa [#allocation6], 0 }
   0x2   :  { %13 = vsyncpa [#allocation4], 0  ;;  %s25_s23 = sshll.u32 %s460_s3, 4  ;;  %s369_s24 = smov [#allocation2]   ;;  %s26_s23 = int_to_ptr.hbm [resolvable:$true] %s25_s23 }
   0x3   :  { %s27_s25 = sshll.u32 %s369_s24, 4  ;;  %s38_s28 = sshll.u32 %s462_s5, 4  ;;  %s28_s25 = int_to_ptr.vmem [resolvable:$true] %s27_s25  ;;  %s39_s28 = int_to_ptr.hbm [resolvable:$true] %s38_s28 }
   0x4   :  { %30 = dma.hbm_to_vmem [thread:$0]  %s26_s23, 16, %s28_s25, [#allocation3]  }
   0x5   :  { %s370_s29 = smov [#allocation5]  }
   0x6   :  { %s40_s30 = sshll.u32 %s370_s29, 4  ;;  %s41_s30 = int_to_ptr.vmem [resolvable:$true] %s40_s30 }
   0x7   :  { %43 = dma.hbm_to_vmem [thread:$0]  %s39_s28, 32, %s41_s30, [#allocation6]  }
   0x8   :  { %363 = dma.done.wait [#allocation3], 16  }
   0x9   :  { %364 = vsyncadd [#allocation3], 4294967280 }
   0xa   :  { %365 = dma.done.wait [#allocation6], 32  }
   0xb   :  { %366 = vsyncadd [#allocation6], 4294967264  ;;  %v52_v0 = vld [vmem:[%s457_s0] sm:$0xf]  ;;  %v54_v1 = vld [vmem:[%s457_s0 + $0x4] sm:$0xf] }
   0xc   :  { %v56_v2 = vmax.f32 %v52_v0, %v54_v1  ;;  %s371_s5 = smov 64   ;;  %v53_v3 = vld [vmem:[%s457_s0 + $0x8] sm:$0xf]  ;;  %v55_v4 = vld [vmem:[%s457_s0 + $0xc] sm:$0xf]  ;;  %v372_v7 = vmov 0  }
   0xd   :  { %v57_v5 = vmax.f32 %v53_v3, %v55_v4  ;;  %v76_v6 = vld [vmem:[%s458_s1] sm:$0xf]  ;;  %281 = vset.pattern.permute.xlu0 %v372_v7  ;;  %s373_s16 = smov 32   ;;  %s374_s17 = smov 16   ;;  %v100_v16 = vld [vmem:[%s459_s2 + $0x8] sm:$0xff]  ;;  %vm84_vm0 = vcmask 125952  }
   0xe   :  { %58 = vrot.lane.b32.xlu0 %v56_v2, %s371_s5  ;;  %v99_v17 = vld [vmem:[%s459_s2] sm:$0xff]  ;;  %126 = vmatpush.msra.mxu0 %v100_v16  ;;  %vm107_vm1 = vcmask 1041409   ;;  %vm109_vm2 = vcmask 130048   ;;  %v134_v41 = vld [vmem:[%s461_s4 + $0x8] sm:$0xff]  ;;  %vm141_vm3 = vcmask 64512   ;;  %vm228_vm11 = vcmask 1040384  }
   0xf   :  { %v133_v40 = vld [vmem:[%s461_s4] sm:$0xff]  ;;  %180 = vmatpush.msra.mxu2 %v134_v41  ;;  %vm238_vm13 = vcmask 1043456   ;;  %s375_s25 = smov [#allocation7]   ;;  %s253_s29 = sshll.u32 %s463_s6, 4  ;;  %s254_s29 = int_to_ptr.hbm [resolvable:$true] %s253_s29 }
  0x10   :  { %127 = vmatpush.msra.mxu0 %v99_v17  ;;  %160 = vmatpush.msra.mxu1 %v133_v40  ;;  %v282_v42 = vld [vmem:[#allocation2] ss:$0 sm:$0xff]  ;;  %v135_v46 = vld [vmem:[#allocation5] sm:$0x3]  ;;  %s251_s26 = sshll.u32 %s375_s25, 4  ;;  %s376_s3 = smov 128   ;;  %s252_s26 = int_to_ptr.vmem [resolvable:$true] %s251_s26 }
  0x11   :  { %v137_v47 = vperm.slane %v135_v46, 0  ;;  %v138_v51 = vperm.slane %v135_v46, 1  ;;  %s377_s8 = smov 8  }
  0x16   :  { %60 = vrot.lane.b32.xlu0 %v57_v5, %s371_s5 }
  0x1e   :  { %79 = vperm.xlu0 %281, %v76_v6  }
  0x80   :  { %v59_v8 = vpop.permute.xlu0 %58 }
  0x81   :  { %v62_v9 = vmax.f32 %v56_v2, %v59_v8 }
  0x83   :  { %64 = vrot.lane.b32.xlu1 %v62_v9, %s373_s16 }
  0x88   :  { %v61_v10 = vpop.permute.xlu0 %60 }
  0x89   :  { %v63_v11 = vmax.f32 %v57_v5, %v61_v10 }
  0x8b   :  { %66 = vrot.lane.b32.xlu1 %v63_v11, %s373_s16 }
  0x90   :  { %v80_v19 = vpop.permute.xlu0 %79 }
  0xf5   :  { %v65_v12 = vpop.permute.xlu1 %64 }
  0xf6   :  { %v68_v13 = vmax.f32 %v62_v9, %v65_v12 }
  0xf8   :  { %70 = vrot.lane.b32.xlu2 %v68_v13, %s374_s17 }
  0xfd   :  { %v67_v14 = vpop.permute.xlu1 %66 }
  0xfe   :  { %v69_v15 = vmax.f32 %v63_v11, %v67_v14 }
 0x100   :  { %72 = vrot.lane.b32.xlu2 %v69_v15, %s374_s17 }
 0x152   :  { %v71_v18 = vpop.permute.xlu2 %70 }
 0x153   :  { %v74_v20 = vmax.f32 %v68_v13, %v71_v18 }
 0x155   :  { %v82_v21 = vmul.f32 %v80_v19, %v74_v20  ;;  %v223_v20 = vld [vmem:[%s457_s0] sm:$0xff] }
 0x157   :  { %v85_v22 = vsel %vm84_vm0, %v82_v21, 0.0 }
 0x158   :  { %v86_v23 = vrot.slane %v85_v22, 4 }
 0x15a   :  { %v87_v24 = vadd.f32 %v86_v23, %v85_v22  ;;  %v73_v25 = vpop.permute.xlu2 %72 }
 0x15b   :  { %v75_v26 = vmax.f32 %v69_v15, %v73_v25 }
 0x15c   :  { %v88_v28 = vrot.slane %v87_v24, 2 }
 0x15d   :  { %v83_v27 = vmul.f32 %v80_v19, %v75_v26 }
 0x15e   :  { %v89_v31 = vadd.f32 %v88_v28, %v87_v24  ;;  %v224_v24 = vld [vmem:[%s457_s0 + $0x8] sm:$0xff] }
 0x15f   :  { %v92_v29 = vsel %vm84_vm0, %v83_v27, 0.0 }
 0x160   :  { %v93_v30 = vrot.slane %v92_v29, 4  ;;  %v90_v34 = vrot.slane %v89_v31, 1 }
 0x162   :  { %v94_v32 = vadd.f32 %v93_v30, %v92_v29  ;;  %v91_v37 = vadd.f32 %v90_v34, %v89_v31 }
 0x164   :  { %v95_v33 = vrot.slane %v94_v32, 2 }
 0x166   :  { %v96_v35 = vadd.f32 %v95_v33, %v94_v32 }
 0x168   :  { %v97_v36 = vrot.slane %v96_v35, 1 }
 0x16a   :  { %v98_v38 = vadd.f32 %v97_v36, %v96_v35 }
 0x16c   :  { %v108_v39 = vsel %vm107_vm1, %v98_v38, %v91_v37 }
 0x16d   :  { %267 = vmatmul.msk.f32.vlgmr.msra.gmra.mxu0 %vm109_vm2, %v108_v39 }
 0x1ea   :  { %v129_v43 = vpop.f32.mrf.mxu0 }
 0x1eb   :  { %v130_v44 = vadd.f32 %v282_v42, %v129_v43 }
 0x1ed   :  { %v132_v45 = vmax.f32 %v130_v44, 0.0 }
 0x1ef   :  { %268 = vmatmul.msk.f32.vlgmr.msra.gmra.mxu1 %vm141_vm3, %v132_v45  ;;  %269 = vmatmul.msk.f32.vlgmr.msra.gmra.mxu2 %vm141_vm3, %v132_v45 }
 0x26c   :  { %v162_v48 = vpop.f32.mrf.mxu1 }
 0x26d   :  { %v163_v49 = vadd.f32 %v162_v48, %v137_v47 }
 0x26f   :  { %v270_v50 = vmul.f32 -1.442695, %v163_v49 }
 0x271   :  { %283 = vpow2.f32 %v270_v50 }
 0x272   :  { %v182_v52 = vpop.f32.mrf.mxu2 }
 0x273   :  { %v183_v53 = vadd.f32 %v182_v52, %v138_v51 }
 0x275   :  { %v271_v54 = vmul.f32 -1.442695, %v183_v53 }
 0x277   :  { %v284_v55 = vpop.eup %283  ;;  %285 = vpow2.f32 %v271_v54 }
 0x278   :  { %v191_v56 = vadd.f32 1.0, %v284_v55 }
 0x27a   :  { %287 = vrcp.f32 %v191_v56  ;;  %vm198_vm6 = vweird.f32 %v191_v56  ;;  %v204_v6 = vand.u32 2147483648, %v191_v56  ;;  %v202_v7 = vand.u32 2147483647, %v191_v56 }
 0x27c   :  { %v205_v12 = vor.u32 1.1754944e-38, %v204_v6  ;;  %vm203_vm12 = vcmp.eq.f32.partialorder %v202_v7, 8.507059e+37 }
 0x27d   :  { %v286_v57 = vpop.eup %285 }
 0x27e   :  { %v192_v58 = vadd.f32 1.0, %v286_v57 }
 0x280   :  { %v288_v59 = vpop.eup %287  ;;  %289 = vrcp.f32 %v192_v58  ;;  %v219_v2 = vand.u32 2147483648, %v192_v58  ;;  %v217_v5 = vand.u32 2147483647, %v192_v58  ;;  %vm213_vm8 = vweird.f32 %v192_v58 }
 0x281   :  { %v194_v60 = vmul.f32 %v288_v59, %v191_v56  ;;  %vm199_vm4 = vweird.f32 %v288_v59 }
 0x282   :  { %vm200_vm7 = vmor %vm198_vm6, %vm199_vm4  ;;  %v220_v9 = vor.u32 1.1754944e-38, %v219_v2  ;;  %vm218_vm10 = vcmp.eq.f32.partialorder %v217_v5, 8.507059e+37 }
 0x283   :  { %v195_v61 = vsub.f32 1.0, %v194_v60 }
 0x285   :  { %v196_v63 = vmul.f32 %v288_v59, %v195_v61 }
 0x286   :  { %v290_v62 = vpop.eup %289 }
 0x287   :  { %v209_v0 = vmul.f32 %v290_v62, %v192_v58  ;;  %v197_v3 = vadd.f32 %v288_v59, %v196_v63  ;;  %vm214_vm5 = vweird.f32 %v290_v62 }
 0x288   :  { %vm215_vm9 = vmor %vm213_vm8, %vm214_vm5 }
 0x289   :  { %v210_v1 = vsub.f32 1.0, %v209_v0  ;;  %v201_v10 = vsel %vm200_vm7, %v288_v59, %v197_v3 }
 0x28a   :  { %v206_v15 = vsel %vm203_vm12, %v205_v12, %v201_v10 }
 0x28b   :  { %v211_v4 = vmul.f32 %v290_v62, %v210_v1 }
 0x28d   :  { %v212_v8 = vadd.f32 %v290_v62, %v211_v4 }
 0x28f   :  { %v216_v11 = vsel %vm215_vm9, %v290_v62, %v212_v8 }
 0x290   :  { %v221_v13 = vsel %vm218_vm10, %v220_v9, %v216_v11 }
 0x291   :  { %v227_v14 = vrot.slane %v221_v13, 7 }
 0x293   :  { %v229_v16 = vsel %vm228_vm11, %v206_v15, %v227_v14  ;;  %v230_v17 = vsel %vm107_vm1, %v206_v15, %v227_v14 }
 0x294   :  { %v231_v18 = vrot.slane %v230_v17, 1  ;;  %v233_v19 = vperm.slane %v229_v16, 1  ;;  %v232_v21 = vperm.slane %v229_v16, 0 }
 0x296   :  { %v235_v22 = vperm.slane %v231_v18, 1  ;;  %v236_v23 = vrot.slane %v233_v19, 4  ;;  %v234_v25 = vperm.slane %v231_v18, 0 }
 0x298   :  { %v237_v26 = vrot.slane %v235_v22, 4  ;;  %v239_v27 = vsel %vm238_vm13, %v232_v21, %v236_v23 }
 0x299   :  { %v243_v28 = vmul.f32 %v239_v27, %v223_v20 }
 0x29a   :  { %v240_v29 = vsel %vm238_vm13, %v234_v25, %v237_v26 }
 0x29b   :  { %v244_v30 = vmul.f32 %v240_v29, %v224_v24  ;;  %245 = vst [vmem:[#allocation7] sm:$0xff] %v243_v28 }
 0x29d   :  { %246 = vst [vmem:[#allocation7 + $0x8] sm:$0xff] %v244_v30 }
 0x29e   :  { %259 = dma.vmem_to_hbm [thread:$0]  %s252_s26, 256, %s254_s29, [#allocation4], %s376_s3, %s376_s3, %s377_s8  }
 0x29f   :  { %367 = dma.done.wait [#allocation4], 256  }
 0x2a0   :  { %368 = vsyncadd [#allocation4], 4294967040 }
 0x2a1   :  { %264 = vsyncpa [#allocation3], 1 }
 0x2a2   :  { %265 = vsyncpa [#allocation6], 1 }
 0x2a3   :  { %266 = vsyncpa [#allocation4], 1 }

</bundles_post_ra>
